<compile_context>
chip_gen: v6e
topology: v6e:2x2x1
jax: 0.10.0
libtpu: 0.0.40
codegen_flags: <defaults>
</compile_context>

<pallas_src>
import functools

import jax
import jax.numpy as jnp
import numpy as np
from jax.experimental import pallas as pl
from jax.experimental.pallas import tpu as pltpu

ZNEAR = 1.0
ZFAR = 100.0
EPS = 1e-10


def _shader_kernel(stk_ref, fcol_ref, out_ref, *, blend_sigma, blend_gamma):
    stk = stk_ref[...]                                  # (4K, TP) f32
    four_k, TP = stk.shape
    K = four_k // 4
    C = out_ref.shape[0] - 1

    p2f = pltpu.bitcast(stk[0:K, :], jnp.int32)         # (K, TP), -1 == background
    bw = stk[K:2 * K, :]                                # (K, TP) sum of 3 bary coords
    zbuf = stk[2 * K:3 * K, :]                          # (K, TP)
    dists = stk[3 * K:4 * K, :]                         # (K, TP)
    fcol = fcol_ref[...]                                # (C, Fpad), zero-padded columns
    Fpad = fcol.shape[1]

    mask = (p2f >= 0).astype(jnp.float32)

    # ---- soft (softmax) blending weights, pixels on lanes --------------------
    prob = jax.nn.sigmoid(dists * (-1.0 / blend_sigma)) * mask        # (K, TP)
    keep = 1.0 - prob[0:1, :]
    for k in range(1, K):                                             # K tiny & static
        keep = keep * (1.0 - prob[k:k + 1, :])
    alpha = 1.0 - keep                                                # (1, TP)

    z_inv = (ZFAR - zbuf) * (1.0 / (ZFAR - ZNEAR)) * mask             # (K, TP)
    z_inv_max = jnp.maximum(jnp.max(z_inv, axis=0, keepdims=True), EPS)
    w_num = prob * jnp.exp((z_inv - z_inv_max) * (1.0 / blend_gamma))
    delta = jnp.maximum(jnp.exp((EPS - z_inv_max) * (1.0 / blend_gamma)), EPS)
    denom = jnp.sum(w_num, axis=0, keepdims=True) + delta
    inv_denom = pl.reciprocal(denom, approx=True)                     # EUP slot (free-ish)
    # The module repeats one color across a face's 3 vertices, so barycentric
    # interpolation collapses to a scale by sum(bary) -> fold into the softmax weight.
    wb = w_num * inv_denom * bw                                       # (K, TP)

    # ---- per-face weight scatter (small-F one-hot path) -----------------------
    #   wsum[f, p] = sum_k wb[k, p] * [p2f[k, p] == f]
    # Background (-1) and out-of-range indices never match -> contribute nothing.
    f_iota = jax.lax.broadcasted_iota(jnp.int32, (Fpad, TP), 0)
    wsum = jnp.zeros((Fpad, TP), jnp.float32)
    for k in range(K):
        wsum = jnp.where(f_iota == p2f[k:k + 1, :], wsum + wb[k:k + 1, :], wsum)
    # TODO(synk): for F >> 128 replace this O(F) scatter with a direct row / DMA gather.

    # (C, Fpad) @ (Fpad, TP) -> (C, TP) blended colors; alpha stored separately.
    # Both stores are lane-dense (TP is a multiple of 128 or the full pixel count).
    out_ref[0:C, :] = jnp.dot(fcol, wsum, preferred_element_type=jnp.float32)
    out_ref[C:C + 1, :] = alpha


def _round_up(x, m):
    return ((x + m - 1) // m) * m


def _pick_tile_pixels(P, requested, fpad):
    # Cap TP so the (Fpad, TP) one-hot working set stays ~2 MiB (v7x VMEM-safe).
    budget_tp = max(128, (2 * 1024 * 1024) // (fpad * 4))
    cap = min(requested, P, budget_tp)
    if P % 128 != 0 or cap < 128:
        return P                         # small / odd frame: one full-row block
    best = 128
    for t in range(128, cap + 1, 128):
        if P % t == 0:
            best = t
    return best


@functools.partial(jax.jit,
                   static_argnames=("blend_gamma", "blend_sigma", "tile_pixels"))
def soft_face_color_shader(pix_to_face, bary_coords, zbuf, dists, face_colors,
                           blend_gamma=0.01, blend_sigma=0.0001, tile_pixels=2048):
    """Forward pass of SoftFaceColorShader.  Returns (N, H, W, C+1) float32."""
    N, H, W, K = pix_to_face.shape
    B, Fn, C = face_colors.shape
    Ftot = B * Fn
    P = H * W
    Fpad = max(128, _round_up(Ftot, 128))
    TP = _pick_tile_pixels(P, tile_pixels, Fpad)

    # --- single fused preprocessing pass (one transpose, bary pre-summed) ------
    # Pixels go on the last (lane) axis; p2f travels as its f32 bit-pattern so all four
    # per-pixel inputs DMA as ONE (4K, TP) block per grid step.
    p2f_bits = jax.lax.bitcast_convert_type(pix_to_face.astype(jnp.int32), jnp.float32)
    bw = bary_coords.astype(jnp.float32).sum(-1)          # sum over the 3 vertices
    stacked = jnp.concatenate(
        [p2f_bits.reshape(N, P, K),
         bw.reshape(N, P, K),
         zbuf.astype(jnp.float32).reshape(N, P, K),
         dists.astype(jnp.float32).reshape(N, P, K)], axis=-1)          # (N, P, 4K)
    stacked = stacked.transpose(0, 2, 1)                                # (N, 4K, P)

    # (C, Fpad) color table, faces padded to a lane multiple (aligned MXU contraction).
    fcol = jnp.zeros((C, Fpad), jnp.float32)
    fcol = fcol.at[:, :Ftot].set(face_colors.reshape(Ftot, C).astype(jnp.float32).T)

    kernel = functools.partial(_shader_kernel, blend_sigma=blend_sigma,
                               blend_gamma=blend_gamma)

    out = pl.pallas_call(
        kernel,
        out_shape=jax.ShapeDtypeStruct((N, C + 1, P), jnp.float32),
        grid_spec=pltpu.PrefetchScalarGridSpec(
            num_scalar_prefetch=0,
            grid=(N, P // TP),
            in_specs=[
                pl.BlockSpec((None, 4 * K, TP), lambda n, t: (n, 0, t)),
                pl.BlockSpec((C, Fpad), lambda n, t: (0, 0)),   # resident color table
            ],
            out_specs=pl.BlockSpec((None, C + 1, TP), lambda n, t: (n, 0, t)),
        ),
        compiler_params=pltpu.CompilerParams(
            dimension_semantics=("parallel", "parallel"),
            vmem_limit_bytes=32 * 1024 * 1024),
    )(stacked, fcol)

    # Downstream consumers that accept channel-major (N, C+1, H, W) can use
    # out.reshape(N, C+1, H, W) directly and skip this extra HBM pass.
    return out.transpose(0, 2, 1).reshape(N, H, W, C + 1)


def _reference(pix_to_face, bary_coords, zbuf, dists, face_colors,
               blend_gamma, blend_sigma):
    """Pure numpy reference mirroring interpolate_face_attributes + soft blending."""
    B, Fn, C = face_colors.shape
    vert = np.broadcast_to(face_colors[:, :, None, :], (B, Fn, 3, C)).reshape(B * Fn, 3, C)
    mask = pix_to_face >= 0
    idx = np.where(mask, pix_to_face, 0)
    gathered = vert[idx]                                         # (N,H,W,K,3,C)
    colors = (bary_coords[..., None] * gathered).sum(-2)         # (N,H,W,K,C)
    colors = colors * mask[..., None].astype(np.float32)

    maskf = mask.astype(np.float32)
    prob = (1.0 / (1.0 + np.exp(dists / blend_sigma))) * maskf
    alpha = 1.0 - np.prod(1.0 - prob, axis=-1)
    z_inv = (ZFAR - zbuf) / (ZFAR - ZNEAR) * maskf
    z_inv_max = np.maximum(z_inv.max(-1, keepdims=True), EPS)
    wnum = prob * np.exp((z_inv - z_inv_max) / blend_gamma)
    delta = np.maximum(np.exp((EPS - z_inv_max) / blend_gamma), EPS)
    denom = wnum.sum(-1, keepdims=True) + delta
    w = wnum / denom
    blended = (w[..., None] * colors).sum(-2)
    return np.concatenate([blended, alpha[..., None]], axis=-1).astype(np.float32)


if __name__ == "__main__":
    key = jax.random.PRNGKey(0)
    B, Fn, C = 2, 8, 3                 # face_colors: (batch_s, face_nb, color_nb)
    N, H, W, K = 2, 16, 16, 4          # fragments.pix_to_face: (N, H, W, K)
    Ftot = B * Fn

    k1, k2, k3, k4, k5 = jax.random.split(key, 5)
    face_colors = jax.random.uniform(k1, (B, Fn, C), jnp.float32)
    pix_to_face = jax.random.randint(k2, (N, H, W, K), -1, Ftot, jnp.int32)
    bary_raw = jax.random.uniform(k3, (N, H, W, K, 3), jnp.float32, 0.05, 1.0)
    bary_coords = bary_raw / bary_raw.sum(-1, keepdims=True)
    zbuf = jax.random.uniform(k4, (N, H, W, K), jnp.float32, ZNEAR, 10.0)
    zbuf = jnp.where(pix_to_face >= 0, zbuf, -1.0)
    dists = jax.random.normal(k5, (N, H, W, K), jnp.float32) * 1e-4

    out = soft_face_color_shader(pix_to_face, bary_coords, zbuf, dists, face_colors,
                                 blend_gamma=0.01, blend_sigma=0.0001,
                                 tile_pixels=2048)
    out = jax.block_until_ready(out)

    ref = _reference(np.asarray(pix_to_face), np.asarray(bary_coords),
                     np.asarray(zbuf), np.asarray(dists), np.asarray(face_colors),
                     blend_gamma=0.01, blend_sigma=0.0001)

    assert out.shape == (N, H, W, C + 1)
    # Tolerance 2e-3 to accommodate pl.reciprocal(approx=True).
    assert np.allclose(np.asarray(out), ref, atol=2e-3, rtol=2e-3)
    print("KERNEL_OK")
</pallas_src>

<mosaic_0001>
module attributes {stable_mosaic.version = 11 : i64} {
  func.func @_shader_kernel(%arg0: i32, %arg1: i32, %arg2: memref<1x16x256xf32, #tpu.memory_space<vmem>>, %arg3: memref<3x128xf32, #tpu.memory_space<vmem>>, %arg4: memref<1x4x256xf32, #tpu.memory_space<vmem>>) attributes {dimension_semantics = [#tpu.dimension_semantics<parallel>, #tpu.dimension_semantics<parallel>], iteration_bounds = array<i64: 2, 1>, scalar_prefetch = 0 : i64, scratch_operands = 0 : i64, tpu.core_type = #tpu.core_type<tc>, window_params = [{transform_indices = @transform_0, window_bounds = array<i64: 1, 16, 256>}, {pipeline_mode = #tpu.pipeline_mode<synchronous>, transform_indices = @transform_1, window_bounds = array<i64: 3, 128>}, {transform_indices = @transform_2, window_bounds = array<i64: 1, 4, 256>}]} {
    %c0 = arith.constant 0 : index
    %c0_0 = arith.constant 0 : index
    %c0_1 = arith.constant 0 : index
    %0 = vector.load %arg2[%c0, %c0_0, %c0_1] : memref<1x16x256xf32, #tpu.memory_space<vmem>>, vector<1x16x256xf32>
    %1 = vector.shape_cast %0 : vector<1x16x256xf32> to vector<16x256xf32>
    %2 = vector.extract_strided_slice %1 {offsets = [0, 0], sizes = [4, 256], strides = [1, 1]} : vector<16x256xf32> to vector<4x256xf32>
    %3 = tpu.bitcast %2 : vector<4x256xf32> -> vector<4x256xi32>
    %4 = vector.extract_strided_slice %1 {offsets = [4, 0], sizes = [4, 256], strides = [1, 1]} : vector<16x256xf32> to vector<4x256xf32>
    %5 = vector.extract_strided_slice %1 {offsets = [8, 0], sizes = [4, 256], strides = [1, 1]} : vector<16x256xf32> to vector<4x256xf32>
    %6 = vector.extract_strided_slice %1 {offsets = [12, 0], sizes = [4, 256], strides = [1, 1]} : vector<16x256xf32> to vector<4x256xf32>
    %c0_2 = arith.constant 0 : index
    %c0_3 = arith.constant 0 : index
    %7 = vector.load %arg3[%c0_2, %c0_3] : memref<3x128xf32, #tpu.memory_space<vmem>>, vector<3x128xf32>
    %c0_i32 = arith.constant 0 : i32
    %8 = vector.broadcast %c0_i32 : i32 to vector<4x256xi32>
    %9 = arith.cmpi sge, %3, %8 : vector<4x256xi32>
    %10 = arith.extui %9 : vector<4x256xi1> to vector<4x256xi32>
    %11 = arith.sitofp %10 : vector<4x256xi32> to vector<4x256xf32>
    %cst = arith.constant -1.000000e+04 : f32
    %12 = vector.broadcast %cst : f32 to vector<4x256xf32>
    %13 = arith.mulf %6, %12 : vector<4x256xf32>
    %14 = arith.negf %13 : vector<4x256xf32>
    %15 = math.exp %14 : vector<4x256xf32>
    %cst_4 = arith.constant 1.000000e+00 : f32
    %16 = vector.broadcast %cst_4 : f32 to vector<4x256xf32>
    %17 = arith.addf %16, %15 : vector<4x256xf32>
    %18 = arith.divf %16, %17 : vector<4x256xf32>
    %19 = arith.mulf %18, %11 : vector<4x256xf32>
    %20 = vector.extract_strided_slice %19 {offsets = [0, 0], sizes = [1, 256], strides = [1, 1]} : vector<4x256xf32> to vector<1x256xf32>
    %cst_5 = arith.constant 1.000000e+00 : f32
    %21 = vector.broadcast %cst_5 : f32 to vector<1x256xf32>
    %22 = arith.subf %21, %20 : vector<1x256xf32>
    %23 = vector.extract_strided_slice %19 {offsets = [1, 0], sizes = [1, 256], strides = [1, 1]} : vector<4x256xf32> to vector<1x256xf32>
    %cst_6 = arith.constant 1.000000e+00 : f32
    %24 = vector.broadcast %cst_6 : f32 to vector<1x256xf32>
    %25 = arith.subf %24, %23 : vector<1x256xf32>
    %26 = arith.mulf %22, %25 : vector<1x256xf32>
    %27 = vector.extract_strided_slice %19 {offsets = [2, 0], sizes = [1, 256], strides = [1, 1]} : vector<4x256xf32> to vector<1x256xf32>
    %cst_7 = arith.constant 1.000000e+00 : f32
    %28 = vector.broadcast %cst_7 : f32 to vector<1x256xf32>
    %29 = arith.subf %28, %27 : vector<1x256xf32>
    %30 = arith.mulf %26, %29 : vector<1x256xf32>
    %31 = vector.extract_strided_slice %19 {offsets = [3, 0], sizes = [1, 256], strides = [1, 1]} : vector<4x256xf32> to vector<1x256xf32>
    %cst_8 = arith.constant 1.000000e+00 : f32
    %32 = vector.broadcast %cst_8 : f32 to vector<1x256xf32>
    %33 = arith.subf %32, %31 : vector<1x256xf32>
    %34 = arith.mulf %30, %33 : vector<1x256xf32>
    %cst_9 = arith.constant 1.000000e+00 : f32
    %35 = vector.broadcast %cst_9 : f32 to vector<1x256xf32>
    %36 = arith.subf %35, %34 : vector<1x256xf32>
    %cst_10 = arith.constant 1.000000e+02 : f32
    %37 = vector.broadcast %cst_10 : f32 to vector<4x256xf32>
    %38 = arith.subf %37, %5 : vector<4x256xf32>
    %cst_11 = arith.constant 0.0101010101 : f32
    %39 = vector.broadcast %cst_11 : f32 to vector<4x256xf32>
    %40 = arith.mulf %38, %39 : vector<4x256xf32>
    %41 = arith.mulf %40, %11 : vector<4x256xf32>
    %cst_12 = arith.constant dense<0xFF800000> : vector<256xf32>
    %42 = vector.multi_reduction <maximumf>, %41, %cst_12 [0] : vector<4x256xf32> to vector<256xf32>
    %43 = vector.shape_cast %42 : vector<256xf32> to vector<1x256xf32>
    %cst_13 = arith.constant 1.000000e-10 : f32
    %44 = vector.broadcast %cst_13 : f32 to vector<1x256xf32>
    %45 = arith.maximumf %43, %44 : vector<1x256xf32>
    %46 = vector.broadcast %45 : vector<1x256xf32> to vector<4x256xf32>
    %47 = arith.subf %41, %46 : vector<4x256xf32>
    %cst_14 = arith.constant 1.000000e+02 : f32
    %48 = vector.broadcast %cst_14 : f32 to vector<4x256xf32>
    %49 = arith.mulf %47, %48 : vector<4x256xf32>
    %50 = math.exp %49 : vector<4x256xf32>
    %51 = arith.mulf %19, %50 : vector<4x256xf32>
    %cst_15 = arith.constant 1.000000e-10 : f32
    %52 = vector.broadcast %cst_15 : f32 to vector<1x256xf32>
    %53 = arith.subf %52, %45 : vector<1x256xf32>
    %cst_16 = arith.constant 1.000000e+02 : f32
    %54 = vector.broadcast %cst_16 : f32 to vector<1x256xf32>
    %55 = arith.mulf %53, %54 : vector<1x256xf32>
    %56 = math.exp %55 : vector<1x256xf32>
    %cst_17 = arith.constant 1.000000e-10 : f32
    %57 = vector.broadcast %cst_17 : f32 to vector<1x256xf32>
    %58 = arith.maximumf %56, %57 : vector<1x256xf32>
    %cst_18 = arith.constant dense<0.000000e+00> : vector<256xf32>
    %59 = vector.multi_reduction <add>, %51, %cst_18 [0] : vector<4x256xf32> to vector<256xf32>
    %60 = vector.shape_cast %59 : vector<256xf32> to vector<1x256xf32>
    %61 = arith.addf %60, %58 : vector<1x256xf32>
    %62 = tpu.reciprocal %61 {approx = true} : vector<1x256xf32> -> vector<1x256xf32>
    %63 = vector.broadcast %62 : vector<1x256xf32> to vector<4x256xf32>
    %64 = arith.mulf %51, %63 : vector<4x256xf32>
    %65 = arith.mulf %64, %4 : vector<4x256xf32>
    %66 = tpu.iota {dimensions = array<i32: 0>} : vector<128x256xi32>
    %cst_19 = arith.constant 0.000000e+00 : f32
    %67 = vector.broadcast %cst_19 : f32 to vector<128x256xf32>
    %68 = vector.extract_strided_slice %3 {offsets = [0, 0], sizes = [1, 256], strides = [1, 1]} : vector<4x256xi32> to vector<1x256xi32>
    %69 = vector.broadcast %68 : vector<1x256xi32> to vector<128x256xi32>
    %70 = arith.cmpi eq, %66, %69 : vector<128x256xi32>
    %71 = vector.extract_strided_slice %65 {offsets = [0, 0], sizes = [1, 256], strides = [1, 1]} : vector<4x256xf32> to vector<1x256xf32>
    %72 = vector.broadcast %71 : vector<1x256xf32> to vector<128x256xf32>
    %73 = arith.addf %67, %72 : vector<128x256xf32>
    %74 = arith.select %70, %73, %67 : vector<128x256xi1>, vector<128x256xf32>
    %75 = vector.extract_strided_slice %3 {offsets = [1, 0], sizes = [1, 256], strides = [1, 1]} : vector<4x256xi32> to vector<1x256xi32>
    %76 = vector.broadcast %75 : vector<1x256xi32> to vector<128x256xi32>
    %77 = arith.cmpi eq, %66, %76 : vector<128x256xi32>
    %78 = vector.extract_strided_slice %65 {offsets = [1, 0], sizes = [1, 256], strides = [1, 1]} : vector<4x256xf32> to vector<1x256xf32>
    %79 = vector.broadcast %78 : vector<1x256xf32> to vector<128x256xf32>
    %80 = arith.addf %74, %79 : vector<128x256xf32>
    %81 = arith.select %77, %80, %74 : vector<128x256xi1>, vector<128x256xf32>
    %82 = vector.extract_strided_slice %3 {offsets = [2, 0], sizes = [1, 256], strides = [1, 1]} : vector<4x256xi32> to vector<1x256xi32>
    %83 = vector.broadcast %82 : vector<1x256xi32> to vector<128x256xi32>
    %84 = arith.cmpi eq, %66, %83 : vector<128x256xi32>
    %85 = vector.extract_strided_slice %65 {offsets = [2, 0], sizes = [1, 256], strides = [1, 1]} : vector<4x256xf32> to vector<1x256xf32>
    %86 = vector.broadcast %85 : vector<1x256xf32> to vector<128x256xf32>
    %87 = arith.addf %81, %86 : vector<128x256xf32>
    %88 = arith.select %84, %87, %81 : vector<128x256xi1>, vector<128x256xf32>
    %89 = vector.extract_strided_slice %3 {offsets = [3, 0], sizes = [1, 256], strides = [1, 1]} : vector<4x256xi32> to vector<1x256xi32>
    %90 = vector.broadcast %89 : vector<1x256xi32> to vector<128x256xi32>
    %91 = arith.cmpi eq, %66, %90 : vector<128x256xi32>
    %92 = vector.extract_strided_slice %65 {offsets = [3, 0], sizes = [1, 256], strides = [1, 1]} : vector<4x256xf32> to vector<1x256xf32>
    %93 = vector.broadcast %92 : vector<1x256xf32> to vector<128x256xf32>
    %94 = arith.addf %88, %93 : vector<128x256xf32>
    %95 = arith.select %91, %94, %88 : vector<128x256xi1>, vector<128x256xf32>
    %cst_20 = arith.constant dense<0.000000e+00> : vector<3x256xf32>
    %96 = tpu.matmul %7, %95, %cst_20 {dimension_numbers = #tpu.dot_dimension_numbers<[1], [0], [0], [1], [0, 0, 1, 1], [], []>} : vector<3x128xf32>, vector<128x256xf32>, vector<3x256xf32> -> vector<3x256xf32>
    %c0_21 = arith.constant 0 : index
    %c0_22 = arith.constant 0 : index
    %c0_23 = arith.constant 0 : index
    %97 = vector.load %arg4[%c0_21, %c0_22, %c0_23] : memref<1x4x256xf32, #tpu.memory_space<vmem>>, vector<1x3x256xf32>
    %98 = vector.shape_cast %97 : vector<1x3x256xf32> to vector<3x256xf32>
    %99 = vector.shape_cast %96 : vector<3x256xf32> to vector<1x3x256xf32>
    tpu.vector_store %arg4[%c0_21, %c0_22, %c0_23], %99 {strides = array<i32>} : memref<1x4x256xf32, #tpu.memory_space<vmem>>, vector<1x3x256xf32>,
    %c0_24 = arith.constant 0 : index
    %c3 = arith.constant 3 : index
    %c0_25 = arith.constant 0 : index
    %100 = vector.load %arg4[%c0_24, %c3, %c0_25] : memref<1x4x256xf32, #tpu.memory_space<vmem>>, vector<1x1x256xf32>
    %101 = vector.shape_cast %100 : vector<1x1x256xf32> to vector<1x256xf32>
    %102 = vector.shape_cast %36 : vector<1x256xf32> to vector<1x1x256xf32>
    tpu.vector_store %arg4[%c0_24, %c3, %c0_25], %102 {strides = array<i32>} : memref<1x4x256xf32, #tpu.memory_space<vmem>>, vector<1x1x256xf32>,
    return
  }
  func.func @transform_0(%arg0: i32, %arg1: i32) -> (i32, i32, i32) {
    %c0_i32 = arith.constant 0 : i32
    %c0_i32_0 = arith.constant 0 : i32
    return %arg0, %c0_i32, %arg1 : i32, i32, i32
  }
  func.func @transform_1(%arg0: i32, %arg1: i32) -> (i32, i32) {
    %c0_i32 = arith.constant 0 : i32
    %c0_i32_0 = arith.constant 0 : i32
    %c0_i32_1 = arith.constant 0 : i32
    return %c0_i32, %c0_i32_0 : i32, i32
  }
  func.func @transform_2(%arg0: i32, %arg1: i32) -> (i32, i32, i32) {
    %c0_i32 = arith.constant 0 : i32
    %c0_i32_0 = arith.constant 0 : i32
    return %arg0, %c0_i32, %arg1 : i32, i32, i32
  }
}

</mosaic_0001>

<bundles_post_ra>
// kernel: soft_face_color_shader.1
= control target key start
LH: loop header
LB: loop body
LE: loop exit
PB: predicated region body
PF: predicated region fallthrough
CT: control target
= control target key end

     0   :  { %s1046_s9 = smov 0   ;;  %s1048_s10 = smov 0   ;;  %s1972_s0 = inlined_call_operand.vmem [shape: f32[2,16,256], index: 0, kind: input, shape index: {}]   ;;  %s1973_s1 = inlined_call_operand.vmem [shape: f32[3,128], index: 1, kind: input, shape index: {}]   ;;  %s1974_s2 = inlined_call_operand.vmem [shape: f32[2,4,256], index: 2, kind: output, shape index: {}]  }
   0x1   :  { %s1050_s11 = smov 0  }
   0x2 LB: > { %s24_s12 = sadd.s32 1, %s1023_s10  ;;  %p945_p0 = scmp.ge.s32.totalorder %s1027_s11, 1  ;;  %s1027_s11 = sphi %s1050_s11, %s12_s11   ;;  %s1023_s10 = sphi %s1048_s10, %s2033_s10   ;;  %s1019_s9 = sphi %s1046_s9, %s2032_s9  }
   0x3   : > { %p26_p1 = scmp.ge.s32.totalorder %s24_s12, 2  ;;  %p133_p2 = scmp.lt.s32.totalorder %s1027_s11, 3 }
   0x5   : > { %s2035_s12 = smov (%p26_p1, %s24_s12), 0  ;;  %p134_p3 = pnand %p945_p0, %p133_p2 }
   0x6   : > { %p164_p4 = scmp.lt.s32.totalorder (!%p134_p3), %s1019_s9, 1 }
   0x7   : > { %137 = sbr.rel (%p134_p3) target bundleno = 386 (0x182), region = 28 }
   0xc   : > { %v1029_v0 = vmov 0.0   ;;  %s2037_s9 = smov (!%p164_p4, %s1019_s9), 1  ;;  %vm248_vm1 = vcmask 1043456  }
   0xd   : > { %818 = vmatprep.mubr.f32.mxu0 %v1029_v0  ;;  %s957_s13 = sshll.u32 %s2037_s9, 5  ;;  %s958_s19 = sshll.u32 %s2037_s9, 3 }
   0xe   : > { %s171_s16 = scalar_lea.vmem %s1972_s0, %s957_s13  ;;  %s181_s22 = scalar_lea.vmem %s1974_s2, %s958_s19 }
   0xf   : > { %v1070_v1 = vld [vmem:[%s171_s16 + $0x8] sm:$0xff]  ;;  %v185_v2 = vld [vmem:[%s171_s16 + $0x10] sm:$0xff]  ;;  %v186_v3 = vld [vmem:[%s171_s16 + $0x18] sm:$0xff] }
  0x10   : > { %vm191_vm0 = vcmp.ge.s32.totalorder %v1070_v1, 0  ;;  %v952_v4 = vmul.f32 10000.0, %v185_v2  ;;  %v953_v5 = vmul.f32 10000.0, %v186_v3  ;;  %v242_v6 = vsub.f32 100.0, %v185_v2  ;;  %v1073_v8 = vld [vmem:[%s171_s16] sm:$0xff] }
  0x11   : > { %v243_v7 = vsub.f32 100.0, %v186_v3  ;;  %v951_v9 = vsel %vm191_vm0, 1.0, %v1029_v0  ;;  %vm190_vm2 = vcmp.ge.s32.totalorder %v1073_v8, 0 }
  0x12   : > { %v200_v10 = vmul.f32 1.442695, %v952_v4  ;;  %v202_v11 = vmul.f32 1.442695, %v953_v5  ;;  %v244_v12 = vmul.f32 0.01010101, %v242_v6 }
  0x13   : > { %v245_v13 = vmul.f32 0.01010101, %v243_v7  ;;  %v950_v15 = vsel %vm190_vm2, 1.0, %v1029_v0  ;;  %v213_v47 = vrot.slane %v951_v9, 4 }
  0x14   : > { %985 = vpow2.f32 %v202_v11  ;;  %v246_v16 = vmul.f32 %v950_v15, %v244_v12  ;;  %v212_v50 = vrot.slane %v950_v15, 4  ;;  %v319_v15 = vlaneseq }
  0x15   : > { %v247_v14 = vmul.f32 %v951_v9, %v245_v13  ;;  %987 = vpow2.f32 %v200_v10 }
  0x16   : > { %v249_v19 = vsel %vm248_vm1, %v246_v16, -inf }
  0x17   : > { %v256_v17 = vsel %vm248_vm1, %v247_v14, -inf  ;;  %v250_v20 = vrot.slane %v249_v19, 4 }
  0x18   : > { %v257_v18 = vrot.slane %v256_v17, 4 }
  0x19   : > { %v251_v22 = vmax.f32 %v249_v19, %v250_v20 }
  0x1a   : > { %v258_v21 = vmax.f32 %v256_v17, %v257_v18 }
  0x1b   : > { %v252_v24 = vrot.slane %v251_v22, 2 }
  0x1c   : > { %v259_v23 = vrot.slane %v258_v21, 2 }
  0x1d   : > { %v253_v26 = vmax.f32 %v251_v22, %v252_v24 }
  0x1e   : > { %v260_v25 = vmax.f32 %v258_v21, %v259_v23  ;;  %v1090_v21 = vshrl.u32 %v319_v15, 7 }
  0x1f   : > { %v254_v28 = vrot.slane %v253_v26, 1 }
  0x20   : > { %v261_v27 = vrot.slane %v260_v25, 1  ;;  %v338_v23 = vsub.s32 0, %v1090_v21  ;;  %v420_v24 = vsub.s32 1, %v1090_v21 }
  0x21   : > { %v986_v29 = vpop.eup %985  ;;  %v255_v32 = vmax.f32 %v253_v26, %v254_v28 }
  0x22   : > { %v262_v30 = vmax.f32 %v260_v25, %v261_v27  ;;  %v988_v31 = vpop.eup %987  ;;  %v205_v33 = vadd.f32 1.0, %v986_v29  ;;  %v1095_v25 = vadd.s32 120, %v1090_v21  ;;  %v1098_v26 = vrot.slane %v1070_v1, %v338_v23 }
  0x23   : > { %v263_v35 = vmax.f32 %v255_v32, 1e-10  ;;  %v204_v36 = vadd.f32 1.0, %v988_v31  ;;  %v532_v27 = vsub.s32 2, %v1090_v21  ;;  %v1102_v28 = vrot.slane %v1070_v1, %v420_v24 }
  0x24   : > { %v264_v34 = vmax.f32 %v262_v30, 1e-10  ;;  %989 = vrcp.f32 %v205_v33  ;;  %v644_v29 = vsub.s32 3, %v1090_v21  ;;  %v1106_v30 = vrot.slane %v1073_v8, %v338_v23 }
  0x25   : > { %v265_v38 = vsub.f32 %v246_v16, %v263_v35  ;;  %991 = vrcp.f32 %v204_v36  ;;  %v281_v44 = vsub.f32 1e-10, %v263_v35  ;;  %v378_v31 = vsub.s32 4, %v1090_v21 }
  0x26   : > { %v266_v37 = vsub.f32 %v247_v14, %v264_v34  ;;  %v282_v43 = vsub.f32 1e-10, %v264_v34  ;;  %v1110_v32 = vadd.s32 112, %v1090_v21  ;;  %v460_v33 = vsub.s32 5, %v1090_v21 }
  0x27   : > { %v267_v40 = vmul.f32 100.0, %v265_v38  ;;  %v283_v46 = vmul.f32 100.0, %v281_v44  ;;  %v572_v34 = vsub.s32 6, %v1090_v21  ;;  %v684_v35 = vsub.s32 7, %v1090_v21 }
  0x28   : > { %v268_v39 = vmul.f32 100.0, %v266_v37  ;;  %v284_v45 = vmul.f32 100.0, %v282_v43  ;;  %v1116_v36 = vadd.s32 104, %v1090_v21  ;;  %vm375_vm3 = vcmp.eq.s32.totalorder %v1095_v25, %v1098_v26 }
  0x29   : > { %v269_v42 = vmul.f32 1.442695, %v267_v40  ;;  %v285_v52 = vmul.f32 1.442695, %v283_v46  ;;  %v1121_v37 = vrot.slane %v1070_v1, %v532_v27  ;;  %v1124_v38 = vrot.slane %v1073_v8, %v420_v24 }
  0x2a   : > { %v271_v41 = vmul.f32 1.442695, %v268_v39  ;;  %v287_v49 = vmul.f32 1.442695, %v284_v45  ;;  %v1127_v39 = vadd.s32 96, %v1090_v21  ;;  %vm457_vm4 = vcmp.eq.s32.totalorder %v1095_v25, %v1102_v28 }
  0x2b   : > { %v1132_v40 = vrot.slane %v1070_v1, %v644_v29  ;;  %vm374_vm5 = vcmp.eq.s32.totalorder %v1095_v25, %v1106_v30  ;;  %v1140_v43 = vrot.slane %v1073_v8, %v644_v29  ;;  %vm373_vm6 = vcmp.eq.s32.totalorder %v1110_v32, %v1098_v26 }
  0x2c   : > { %993 = vpow2.f32 %v271_v41  ;;  %v1137_v41 = vrot.slane %v1073_v8, %v532_v27  ;;  %vm455_vm7 = vcmp.eq.s32.totalorder %v1110_v32, %v1102_v28  ;;  %vm372_vm8 = vcmp.eq.s32.totalorder %v1110_v32, %v1106_v30 }
  0x2d   : > { %995 = vpow2.f32 %v269_v42  ;;  %vm371_vm9 = vcmp.eq.s32.totalorder %v1116_v36, %v1098_v26  ;;  %vm453_vm10 = vcmp.eq.s32.totalorder %v1116_v36, %v1102_v28  ;;  %vm370_vm11 = vcmp.eq.s32.totalorder %v1116_v36, %v1106_v30 }
  0x2e   : > { %997 = vpow2.f32 %v287_v49  ;;  %vm569_vm12 = vcmp.eq.s32.totalorder %v1095_v25, %v1121_v37  ;;  %vm456_vm13 = vcmp.eq.s32.totalorder %v1095_v25, %v1124_v38  ;;  %vm369_vm15 = vcmp.eq.s32.totalorder %v1127_v39, %v1098_v26 }
  0x2f   : > { %999 = vpow2.f32 %v285_v52  ;;  %v1163_v46 = vadd.s32 88, %v1090_v21  ;;  %v1185_v52 = vadd.s32 56, %v1090_v21  ;;  %vm681_vm14 = vcmp.eq.s32.totalorder %v1095_v25, %v1132_v40 }
  0x30   : > { %vm677_vm2 = vcmp.eq.s32.totalorder %v1116_v36, %v1132_v40 }
  0x31   : > { %v990_v48 = vpop.eup %989 }
  0x32   : > { %v992_v51 = vpop.eup %991  ;;  %v1078_v53 = vmul.f32 %v990_v48, %v213_v47  ;;  %v1166_v47 = vadd.s32 80, %v1090_v21  ;;  %v1169_v48 = vadd.s32 72, %v1090_v21 }
  0x33   : > { %v1080_v56 = vmul.f32 %v992_v51, %v212_v50  ;;  %v1178_v51 = vadd.s32 64, %v1090_v21 }
  0x34   : > { %vm364_vm0 = vcmp.eq.s32.totalorder %v1166_v47, %v1106_v30 }
  0x39   : > { %v994_v54 = vpop.eup %993 }
  0x3a   : > { %v276_v55 = vrot.slane %v994_v54, 4  ;;  %v996_v57 = vpop.eup %995  ;;  %v1191_v54 = vadd.s32 40, %v1090_v21 }
  0x3b   : > { %v275_v59 = vrot.slane %v996_v57, 4  ;;  %v998_v7 = vpop.eup %997 }
  0x3c   : > { %v280_v58 = vmul.f32 %v276_v55, %v1078_v53  ;;  %v1000_v11 = vpop.eup %999  ;;  %v290_v12 = vmax.f32 %v998_v7, 1e-10  ;;  %v1194_v55 = vadd.s32 32, %v1090_v21 }
  0x3d   : > { %v1084_v61 = vmul.f32 %v275_v59, %v1080_v56  ;;  %v289_v17 = vmax.f32 %v1000_v11, 1e-10  ;;  %v1209_v59 = vadd.s32 24, %v1090_v21 }
  0x3e   : > { %v294_v60 = vrot.slane %v280_v58, 4 }
  0x3f   : > { %v293_v63 = vrot.slane %v1084_v61, 4 }
  0x40   : > { %v304_v62 = vsel %vm248_vm1, %v294_v60, 0.0  ;;  %v1212_v60 = vadd.s32 16, %v1090_v21 }
  0x41   : > { %v305_v0 = vrot.slane %v304_v62, 4  ;;  %v297_v2 = vsel %vm248_vm1, %v293_v63, 0.0  ;;  %vm451_vm1 = vcmp.eq.s32.totalorder %v1127_v39, %v1102_v28 }
  0x42   : > { %v298_v4 = vrot.slane %v297_v2, 4 }
  0x43   : > { %v306_v3 = vadd.f32 %v305_v0, %v304_v62  ;;  %v1224_v0 = vadd.s32 8, %v1090_v21 }
  0x44   : > { %v299_v6 = vadd.f32 %v298_v4, %v297_v2 }
  0x45   : > { %v307_v5 = vrot.slane %v306_v3, 2 }
  0x46   : > { %v300_v10 = vrot.slane %v299_v6, 2 }
  0x47   : > { %v308_v9 = vadd.f32 %v307_v5, %v306_v3 }
  0x48   : > { %v301_v14 = vadd.f32 %v300_v10, %v299_v6 }
  0x49   : > { %v309_v13 = vrot.slane %v308_v9, 1 }
  0x4a   : > { %v302_v18 = vrot.slane %v301_v14, 1 }
  0x4b   : > { %v310_v16 = vadd.f32 %v309_v13, %v308_v9 }
  0x4c   : > { %v303_v20 = vadd.f32 %v302_v18, %v301_v14 }
  0x4d   : > { %v312_v19 = vadd.f32 %v310_v16, %v290_v12 }
  0x4e   : > { %v311_v22 = vadd.f32 %v303_v20, %v289_v17 }
  0x4f   : > { %1001 = vrcp.f32 %v312_v19 }
  0x50   : > { %1003 = vrcp.f32 %v311_v22 }
  0x5c   : > { %v1002_v42 = vpop.eup %1001 }
  0x5d   : > { %v316_v44 = vmul.f32 %v1002_v42, %v280_v58  ;;  %v1004_v45 = vpop.eup %1003 }
  0x5e   : > { %v315_v50 = vmul.f32 %v1004_v45, %v1084_v61 }
  0x5f   : > { %v318_v49 = vmul.f32 %v316_v44, %v1070_v1  ;;  %v1188_v1 = vadd.s32 48, %v1090_v21 }
  0x60   : > { %v317_v63 = vmul.f32 %v315_v50, %v1073_v8 }
  0x61   : > { %v1198_v57 = vrot.slane %v318_v49, %v378_v31  ;;  %v1200_v58 = vrot.slane %v318_v49, %v460_v33  ;;  %v1214_v61 = vrot.slane %v318_v49, %v572_v34  ;;  %v1218_v62 = vrot.slane %v318_v49, %v684_v35 }
  0x62   : > { %v1253_v6 = vrot.slane %v317_v63, %v378_v31  ;;  %v1255_v7 = vrot.slane %v317_v63, %v460_v33  ;;  %v1257_v9 = vrot.slane %v317_v63, %v572_v34  ;;  %v1267_v10 = vrot.slane %v317_v63, %v684_v35 }
  0x63   : > { %v417_v2 = vsel %vm375_vm3, %v1198_v57, 0.0  ;;  %v415_v3 = vsel %vm373_vm6, %v1198_v57, 0.0  ;;  %v413_v8 = vsel %vm371_vm9, %v1198_v57, 0.0  ;;  %v411_v4 = vsel %vm369_vm15, %v1198_v57, 0.0 }
  0x64   : > { %vm563_vm3 = vcmp.eq.s32.totalorder %v1127_v39, %v1121_v37  ;;  %v497_v5 = vadd.f32 %v1200_v58, %v417_v2  ;;  %vm680_vm9 = vcmp.eq.s32.totalorder %v1095_v25, %v1140_v43  ;;  %vm678_vm15 = vcmp.eq.s32.totalorder %v1110_v32, %v1140_v43 }
  0x65   : > { %v495_v11 = vadd.f32 %v1200_v58, %v415_v3  ;;  %v493_v12 = vadd.f32 %v1200_v58, %v413_v8  ;;  %v491_v13 = vadd.f32 %v1200_v58, %v411_v4  ;;  %v416_v16 = vsel %vm374_vm5, %v1253_v6, 0.0 }
  0x66   : > { %v529_v14 = vsel %vm457_vm4, %v497_v5, %v417_v2  ;;  %v414_v17 = vsel %vm372_vm8, %v1253_v6, 0.0  ;;  %v412_v18 = vsel %vm370_vm11, %v1253_v6, 0.0  ;;  %vm675_vm6 = vcmp.eq.s32.totalorder %v1127_v39, %v1132_v40 }
  0x67   : > { %vm365_vm4 = vcmp.eq.s32.totalorder %v1166_v47, %v1098_v26  ;;  %v609_v19 = vadd.f32 %v1214_v61, %v529_v14  ;;  %v496_v20 = vadd.f32 %v1255_v7, %v416_v16  ;;  %v527_v22 = vsel %vm455_vm7, %v495_v11, %v415_v3 }
  0x68   : > { %v494_v23 = vadd.f32 %v1255_v7, %v414_v17  ;;  %vm676_vm5 = vcmp.eq.s32.totalorder %v1116_v36, %v1140_v43  ;;  %vm450_vm8 = vcmp.eq.s32.totalorder %v1127_v39, %v1124_v38  ;;  %v607_v24 = vadd.f32 %v1214_v61, %v527_v22 }
  0x69   : > { %v525_v27 = vsel %vm453_vm10, %v493_v12, %v413_v8  ;;  %v492_v29 = vadd.f32 %v1255_v7, %v412_v18  ;;  %v523_v31 = vsel %vm451_vm1, %v491_v13, %v411_v4  ;;  %v641_v33 = vsel %vm569_vm12, %v609_v19, %v529_v14 }
  0x6a   : > { %v528_v34 = vsel %vm456_vm13, %v496_v20, %v416_v16  ;;  %vm1975_vm10 = vcmp.eq.s32.totalorder %v1110_v32, %v1124_v38  ;;  %v605_v42 = vadd.f32 %v1214_v61, %v525_v27  ;;  %vm447_vm1 = vcmp.eq.s32.totalorder %v1166_v47, %v1102_v28 }
  0x6b   : > { %v526_v35 = vsel %vm1975_vm10, %v494_v23, %v414_v17  ;;  %v721_v44 = vadd.f32 %v1218_v62, %v641_v33  ;;  %v608_v45 = vadd.f32 %v1257_v9, %v528_v34  ;;  %vm1976_vm12 = vcmp.eq.s32.totalorder %v1110_v32, %v1121_v37 }
  0x6c   : > { %v639_v49 = vsel %vm1976_vm12, %v607_v24, %v527_v22  ;;  %v606_v50 = vadd.f32 %v1257_v9, %v526_v35  ;;  %vm561_vm10 = vcmp.eq.s32.totalorder %v1163_v46, %v1121_v37  ;;  %vm1977_vm11 = vcmp.eq.s32.totalorder %v1116_v36, %v1121_v37 }
  0x6d   : > { %v719_v63 = vadd.f32 %v1218_v62, %v639_v49  ;;  %v637_v2 = vsel %vm1977_vm11, %v605_v42, %v525_v27  ;;  %vm1978_vm12 = vcmp.eq.s32.totalorder %v1116_v36, %v1124_v38  ;;  %v603_v8 = vadd.f32 %v1214_v61, %v523_v31 }
  0x6e   : > { %v524_v3 = vsel %vm1978_vm12, %v492_v29, %v412_v18  ;;  %v753_v4 = vsel %vm681_vm14, %v721_v44, %v641_v33  ;;  %vm1979_vm7 = vcmp.eq.s32.totalorder %v1095_v25, %v1137_v41  ;;  %vm1980_vm11 = vcmp.eq.s32.totalorder %v1110_v32, %v1137_v41 }
  0x6f   : > { %v640_v5 = vsel %vm1979_vm7, %v608_v45, %v528_v34  ;;  %v638_v11 = vsel %vm1980_vm11, %v606_v50, %v526_v35  ;;  %v717_v12 = vadd.f32 %v1218_v62, %v637_v2  ;;  %vm559_vm12 = vcmp.eq.s32.totalorder %v1166_v47, %v1121_v37  ;;  %754 = vmatprep.subr.mxu0 %v753_v4 }
  0x70   : > { %v720_v13 = vadd.f32 %v1267_v10, %v640_v5  ;;  %vm1981_vm13 = vcmp.eq.s32.totalorder %v1110_v32, %v1132_v40  ;;  %v718_v16 = vadd.f32 %v1267_v10, %v638_v11  ;;  %v604_v17 = vadd.f32 %v1257_v9, %v524_v3 }
  0x71   : > { %v751_v14 = vsel %vm1981_vm13, %v719_v63, %v639_v49  ;;  %v749_v18 = vsel %vm677_vm2, %v717_v12, %v637_v2  ;;  %v635_v19 = vsel %vm563_vm3, %v603_v8, %v523_v31  ;;  %vm1982_vm13 = vcmp.eq.s32.totalorder %v1127_v39, %v1106_v30 }
  0x72   : > { %v410_v20 = vsel %vm1982_vm13, %v1253_v6, 0.0  ;;  %vm1983_vm7 = vcmp.eq.s32.totalorder %v1163_v46, %v1098_v26  ;;  %vm672_vm11 = vcmp.eq.s32.totalorder %v1163_v46, %v1140_v43  ;;  %vm445_vm2 = vcmp.eq.s32.totalorder %v1169_v48, %v1102_v28 }
  0x73   : > { %v409_v22 = vsel %vm1983_vm7, %v1198_v57, 0.0  ;;  %vm444_vm14 = vcmp.eq.s32.totalorder %v1169_v48, %v1124_v38  ;;  %v752_v23 = vsel %vm680_vm9, %v720_v13, %v640_v5  ;;  %v750_v24 = vsel %vm678_vm15, %v718_v16, %v638_v11 }
  0x74   : > { %vm1984_vm3 = vcmp.eq.s32.totalorder %v1116_v36, %v1137_v41  ;;  %v715_v29 = vadd.f32 %v1218_v62, %v635_v19  ;;  %vm671_vm7 = vcmp.eq.s32.totalorder %v1166_v47, %v1132_v40  ;;  %755 = vmatpush1.msra.mxu0 %v752_v23  ;;  %v490_v31 = vadd.f32 %v1255_v7, %v410_v20 }
  0x75   : > { %v636_v27 = vsel %vm1984_vm3, %v604_v17, %v524_v3  ;;  %v489_v32 = vadd.f32 %v1200_v58, %v409_v22  ;;  %vm1985_vm9 = vcmp.eq.s32.totalorder %v1163_v46, %v1106_v30  ;;  %vm670_vm15 = vcmp.eq.s32.totalorder %v1166_v47, %v1140_v43  ;;  %756 = vmatprep.subr.mxu0 %v751_v14 }
  0x76   : > { %v716_v25 = vadd.f32 %v1267_v10, %v636_v27  ;;  %v408_v33 = vsel %vm1985_vm9, %v1253_v6, 0.0  ;;  %vm360_vm3 = vcmp.eq.s32.totalorder %v1178_v51, %v1106_v30  ;;  %v747_v34 = vsel %vm675_vm6, %v715_v29, %v635_v19  ;;  %757 = vmatpush1.msra.mxu0 %v750_v24 }
  0x77   : > { %v488_v35 = vadd.f32 %v1255_v7, %v408_v33  ;;  %v407_v42 = vsel %vm365_vm4, %v1198_v57, 0.0  ;;  %v406_v44 = vsel %vm364_vm0, %v1253_v6, 0.0  ;;  %vm557_vm9 = vcmp.eq.s32.totalorder %v1169_v48, %v1121_v37  ;;  %758 = vmatprep.subr.mxu0 %v749_v18 }
  0x78   : > { %vm556_vm13 = vcmp.eq.s32.totalorder %v1169_v48, %v1137_v41  ;;  %v748_v45 = vsel %vm676_vm5, %v716_v25, %v636_v27  ;;  %v522_v49 = vsel %vm450_vm8, %v490_v31, %v410_v20  ;;  %vm1986_vm6 = vcmp.eq.s32.totalorder %v1163_v46, %v1102_v28 }
  0x79   : > { %v521_v50 = vsel %vm1986_vm6, %v489_v32, %v409_v22  ;;  %v487_v63 = vadd.f32 %v1200_v58, %v407_v42  ;;  %vm443_vm0 = vcmp.eq.s32.totalorder %v1178_v51, %v1102_v28  ;;  %v602_v36 = vadd.f32 %v1257_v9, %v522_v49  ;;  %759 = vmatpush1.msra.mxu0 %v748_v45 }
  0x7a   : > { %v601_v2 = vadd.f32 %v1214_v61, %v521_v50  ;;  %vm1987_vm5 = vcmp.eq.s32.totalorder %v1163_v46, %v1124_v38  ;;  %v486_v8 = vadd.f32 %v1255_v7, %v406_v44  ;;  %vm1988_vm4 = vcmp.eq.s32.totalorder %v1169_v48, %v1098_v26  ;;  %760 = vmatprep.subr.mxu0 %v747_v34 }
  0x7b   : > { %v520_v3 = vsel %vm1987_vm5, %v488_v35, %v408_v33  ;;  %v519_v5 = vsel %vm447_vm1, %v487_v63, %v407_v42  ;;  %v405_v11 = vsel %vm1988_vm4, %v1198_v57, 0.0  ;;  %vm1989_vm8 = vcmp.eq.s32.totalorder %v1169_v48, %v1106_v30 }
  0x7c   : > { %v600_v4 = vadd.f32 %v1257_v9, %v520_v3  ;;  %v404_v12 = vsel %vm1989_vm8, %v1253_v6, 0.0  ;;  %vm1990_vm1 = vcmp.eq.s32.totalorder %v1127_v39, %v1137_v41  ;;  %v633_v14 = vsel %vm561_vm10, %v601_v2, %v521_v50 }
  0x7d   : > { %v634_v13 = vsel %vm1990_vm1, %v602_v36, %v522_v49  ;;  %v599_v16 = vadd.f32 %v1214_v61, %v519_v5  ;;  %vm1991_vm4 = vcmp.eq.s32.totalorder %v1166_v47, %v1124_v38  ;;  %vm555_vm8 = vcmp.eq.s32.totalorder %v1178_v51, %v1121_v37 }
  0x7e   : > { %v518_v17 = vsel %vm1991_vm4, %v486_v8, %v406_v44  ;;  %v714_v18 = vadd.f32 %v1267_v10, %v634_v13  ;;  %v713_v19 = vadd.f32 %v1218_v62, %v633_v14  ;;  %vm1992_vm10 = vcmp.eq.s32.totalorder %v1163_v46, %v1137_v41 }
  0x7f   : > { %v632_v20 = vsel %vm1992_vm10, %v600_v4, %v520_v3  ;;  %v598_v22 = vadd.f32 %v1257_v9, %v518_v17  ;;  %v631_v24 = vsel %vm559_vm12, %v599_v16, %v519_v5  ;;  %v485_v27 = vadd.f32 %v1200_v58, %v405_v11 }
  0x80   : > { %v712_v23 = vadd.f32 %v1267_v10, %v632_v20  ;;  %v484_v29 = vadd.f32 %v1255_v7, %v404_v12  ;;  %vm1993_vm10 = vcmp.eq.s32.totalorder %v1127_v39, %v1140_v43  ;;  %vm1994_vm4 = vcmp.eq.s32.totalorder %v1163_v46, %v1132_v40 }
  0x81   : > { %v746_v25 = vsel %vm1993_vm10, %v714_v18, %v634_v13  ;;  %v745_v31 = vsel %vm1994_vm4, %v713_v19, %v633_v14  ;;  %v711_v32 = vadd.f32 %v1218_v62, %v631_v24  ;;  %vm1995_vm6 = vcmp.eq.s32.totalorder %v1166_v47, %v1137_v41 }
  0x82   : > { %v630_v33 = vsel %vm1995_vm6, %v598_v22, %v518_v17  ;;  %vm667_vm12 = vcmp.eq.s32.totalorder %v1178_v51, %v1132_v40  ;;  %vm552_vm1 = vcmp.eq.s32.totalorder %v1185_v52, %v1137_v41  ;;  %vm355_vm5 = vcmp.eq.s32.totalorder %v1191_v54, %v1098_v26  ;;  %761 = vmatpush1.msra.mxu0 %v746_v25 }
  0x83   : > { %v744_v39 = vsel %vm672_vm11, %v712_v23, %v632_v20  ;;  %v710_v34 = vadd.f32 %v1267_v10, %v630_v33  ;;  %v517_v35 = vsel %vm445_vm2, %v485_v27, %v405_v11  ;;  %v516_v42 = vsel %vm444_vm14, %v484_v29, %v404_v12  ;;  %762 = vmatprep.subr.mxu0 %v745_v31 }
  0x84   : > { %vm666_vm6 = vcmp.eq.s32.totalorder %v1178_v51, %v1140_v43  ;;  %vm665_vm4 = vcmp.eq.s32.totalorder %v1185_v52, %v1132_v40  ;;  %vm439_vm10 = vcmp.eq.s32.totalorder %v1188_v1, %v1102_v28  ;;  %v743_v46 = vsel %vm671_vm7, %v711_v32, %v631_v24  ;;  %763 = vmatpush1.msra.mxu0 %v744_v39 }
  0x85   : > { %v597_v44 = vadd.f32 %v1214_v61, %v517_v35  ;;  %v596_v45 = vadd.f32 %v1257_v9, %v516_v42  ;;  %vm1996_vm14 = vcmp.eq.s32.totalorder %v1178_v51, %v1098_v26  ;;  %vm438_vm11 = vcmp.eq.s32.totalorder %v1188_v1, %v1124_v38  ;;  %764 = vmatprep.subr.mxu0 %v743_v46 }
  0x86   : > { %v403_v49 = vsel %vm1996_vm14, %v1198_v57, 0.0  ;;  %v742_v50 = vsel %vm670_vm15, %v710_v34, %v630_v33  ;;  %v402_v36 = vsel %vm360_vm3, %v1253_v6, 0.0  ;;  %vm1997_vm2 = vcmp.eq.s32.totalorder %v1185_v52, %v1098_v26 }
  0x87   : > { %v483_v63 = vadd.f32 %v1200_v58, %v403_v49  ;;  %v401_v2 = vsel %vm1997_vm2, %v1198_v57, 0.0  ;;  %vm664_vm7 = vcmp.eq.s32.totalorder %v1185_v52, %v1140_v43  ;;  %vm353_vm14 = vcmp.eq.s32.totalorder %v1194_v55, %v1098_v26  ;;  %765 = vmatpush1.msra.mxu0 %v742_v50 }
  0x88   : > { %v629_v47 = vsel %vm557_vm9, %v597_v44, %v517_v35  ;;  %v628_v3 = vsel %vm556_vm13, %v596_v45, %v516_v42  ;;  %v482_v8 = vadd.f32 %v1255_v7, %v402_v36  ;;  %v481_v4 = vadd.f32 %v1200_v58, %v401_v2 }
  0x89   : > { %v709_v5 = vadd.f32 %v1218_v62, %v629_v47  ;;  %v708_v11 = vadd.f32 %v1267_v10, %v628_v3  ;;  %v515_v12 = vsel %vm443_vm0, %v483_v63, %v403_v49  ;;  %vm1998_vm13 = vcmp.eq.s32.totalorder %v1185_v52, %v1106_v30 }
  0x8a   : > { %v400_v13 = vsel %vm1998_vm13, %v1253_v6, 0.0  ;;  %v595_v14 = vadd.f32 %v1214_v61, %v515_v12  ;;  %vm1999_vm15 = vcmp.eq.s32.totalorder %v1178_v51, %v1124_v38  ;;  %vm2000_vm2 = vcmp.eq.s32.totalorder %v1185_v52, %v1102_v28 }
  0x8b   : > { %v514_v16 = vsel %vm1999_vm15, %v482_v8, %v402_v36  ;;  %v513_v17 = vsel %vm2000_vm2, %v481_v4, %v401_v2  ;;  %v480_v18 = vadd.f32 %v1255_v7, %v400_v13  ;;  %vm435_vm0 = vcmp.eq.s32.totalorder %v1194_v55, %v1102_v28 }
  0x8c   : > { %vm2001_vm9 = vcmp.eq.s32.totalorder %v1169_v48, %v1132_v40  ;;  %vm2002_vm3 = vcmp.eq.s32.totalorder %v1169_v48, %v1140_v43  ;;  %v594_v22 = vadd.f32 %v1257_v9, %v514_v16  ;;  %v593_v23 = vadd.f32 %v1214_v61, %v513_v17 }
  0x8d   : > { %v741_v19 = vsel %vm2001_vm9, %v709_v5, %v629_v47  ;;  %v740_v20 = vsel %vm2002_vm3, %v708_v11, %v628_v3  ;;  %vm663_vm15 = vcmp.eq.s32.totalorder %v1188_v1, %v1132_v40  ;;  %v627_v24 = vsel %vm555_vm8, %v595_v14, %v515_v12 }
  0x8e   : > { %766 = vmatprep.subr.mxu0 %v741_v19  ;;  %vm2003_vm3 = vcmp.eq.s32.totalorder %v1185_v52, %v1124_v38  ;;  %vm2004_vm9 = vcmp.eq.s32.totalorder %v1188_v1, %v1098_v26  ;;  %vm2005_vm2 = vcmp.eq.s32.totalorder %v1188_v1, %v1106_v30  ;;  %vm434_vm8 = vcmp.eq.s32.totalorder %v1194_v55, %v1124_v38 }
  0x8f   : > { %v512_v48 = vsel %vm2003_vm3, %v480_v18, %v400_v13  ;;  %v399_v27 = vsel %vm2004_vm9, %v1198_v57, 0.0  ;;  %v398_v29 = vsel %vm2005_vm2, %v1253_v6, 0.0  ;;  %767 = vmatpush1.msra.mxu0 %v740_v20  ;;  %v707_v25 = vadd.f32 %v1218_v62, %v627_v24 }
  0x90   : > { %vm2006_vm3 = vcmp.eq.s32.totalorder %v1178_v51, %v1137_v41  ;;  %vm2007_vm9 = vcmp.eq.s32.totalorder %v1185_v52, %v1121_v37  ;;  %v592_v33 = vadd.f32 %v1257_v9, %v512_v48  ;;  %vm547_vm2 = vcmp.eq.s32.totalorder %v1194_v55, %v1121_v37 }
  0x91   : > { %v626_v31 = vsel %vm2006_vm3, %v594_v22, %v514_v16  ;;  %v625_v32 = vsel %vm2007_vm9, %v593_v23, %v513_v17  ;;  %v479_v35 = vadd.f32 %v1200_v58, %v399_v27  ;;  %v478_v42 = vadd.f32 %v1255_v7, %v398_v29 }
  0x92   : > { %v706_v39 = vadd.f32 %v1267_v10, %v626_v31  ;;  %v705_v34 = vadd.f32 %v1218_v62, %v625_v32  ;;  %v739_v46 = vsel %vm667_vm12, %v707_v25, %v627_v24  ;;  %v624_v44 = vsel %vm552_vm1, %v592_v33, %v512_v48 }
  0x93   : > { %v397_v45 = vsel %vm355_vm5, %v1198_v57, 0.0  ;;  %vm2008_vm3 = vcmp.eq.s32.totalorder %v1191_v54, %v1106_v30  ;;  %vm546_vm9 = vcmp.eq.s32.totalorder %v1194_v55, %v1137_v41  ;;  %vm433_vm12 = vcmp.eq.s32.totalorder %v1209_v59, %v1102_v28  ;;  %768 = vmatprep.subr.mxu0 %v739_v46 }
  0x94   : > { %v396_v49 = vsel %vm2008_vm3, %v1253_v6, 0.0  ;;  %vm349_vm13 = vcmp.eq.s32.totalorder %v1212_v60, %v1098_v26  ;;  %vm348_vm1 = vcmp.eq.s32.totalorder %v1212_v60, %v1106_v30  ;;  %v738_v50 = vsel %vm666_vm6, %v706_v39, %v626_v31 }
  0x95   : > { %v737_v63 = vsel %vm665_vm4, %v705_v34, %v625_v32  ;;  %v704_v36 = vadd.f32 %v1267_v10, %v624_v44  ;;  %v511_v2 = vsel %vm439_vm10, %v479_v35, %v399_v27  ;;  %vm659_vm5 = vcmp.eq.s32.totalorder %v1194_v55, %v1132_v40  ;;  %769 = vmatpush1.msra.mxu0 %v738_v50 }
  0x96   : > { %vm432_vm3 = vcmp.eq.s32.totalorder %v1209_v59, %v1124_v38  ;;  %v591_v51 = vadd.f32 %v1214_v61, %v511_v2  ;;  %v510_v47 = vsel %vm438_vm11, %v478_v42, %v398_v29  ;;  %v477_v3 = vadd.f32 %v1200_v58, %v397_v45  ;;  %770 = vmatprep.subr.mxu0 %v737_v63 }
  0x97   : > { %v476_v8 = vadd.f32 %v1255_v7, %v396_v49  ;;  %v736_v4 = vsel %vm664_vm7, %v704_v36, %v624_v44  ;;  %v590_v5 = vadd.f32 %v1257_v9, %v510_v47  ;;  %v395_v11 = vsel %vm353_vm14, %v1198_v57, 0.0 }
  0x98   : > { %vm2009_vm6 = vcmp.eq.s32.totalorder %v1194_v55, %v1106_v30  ;;  %771 = vmatpush1.msra.mxu0 %v736_v4  ;;  %vm2010_vm10 = vcmp.eq.s32.totalorder %v1188_v1, %v1121_v37  ;;  %vm2011_vm14 = vcmp.eq.s32.totalorder %v1191_v54, %v1102_v28  ;;  %v475_v16 = vadd.f32 %v1200_v58, %v395_v11 }
  0x99   : > { %v394_v12 = vsel %vm2009_vm6, %v1253_v6, 0.0  ;;  %v623_v52 = vsel %vm2010_vm10, %v591_v51, %v511_v2  ;;  %v509_v13 = vsel %vm2011_vm14, %v477_v3, %v397_v45  ;;  %vm2012_vm6 = vcmp.eq.s32.totalorder %v1191_v54, %v1124_v38 }
  0x9a   : > { %v508_v14 = vsel %vm2012_vm6, %v476_v8, %v396_v49  ;;  %vm544_vm11 = vcmp.eq.s32.totalorder %v1209_v59, %v1137_v41  ;;  %vm431_vm7 = vcmp.eq.s32.totalorder %v1212_v60, %v1102_v28  ;;  %v703_v17 = vadd.f32 %v1218_v62, %v623_v52 }
  0x9b   : > { %vm2013_vm10 = vcmp.eq.s32.totalorder %v1188_v1, %v1137_v41  ;;  %v589_v19 = vadd.f32 %v1214_v61, %v509_v13  ;;  %v588_v20 = vadd.f32 %v1257_v9, %v508_v14  ;;  %v507_v23 = vsel %vm435_vm0, %v475_v16, %v395_v11 }
  0x9c   : > { %v622_v18 = vsel %vm2013_vm10, %v590_v5, %v510_v47  ;;  %v474_v24 = vadd.f32 %v1255_v7, %v394_v12  ;;  %vm2014_vm6 = vcmp.eq.s32.totalorder %v1209_v59, %v1098_v26  ;;  %v735_v27 = vsel %vm663_vm15, %v703_v17, %v623_v52 }
  0x9d   : > { %v702_v22 = vadd.f32 %v1267_v10, %v622_v18  ;;  %v393_v48 = vsel %vm2014_vm6, %v1198_v57, 0.0  ;;  %vm2015_vm0 = vcmp.eq.s32.totalorder %v1191_v54, %v1121_v37  ;;  %vm2016_vm14 = vcmp.eq.s32.totalorder %v1191_v54, %v1137_v41  ;;  %772 = vmatprep.subr.mxu0 %v735_v27 }
  0x9e   : > { %v621_v29 = vsel %vm2015_vm0, %v589_v19, %v509_v13  ;;  %v620_v25 = vsel %vm2016_vm14, %v588_v20, %v508_v14  ;;  %v587_v31 = vadd.f32 %v1214_v61, %v507_v23  ;;  %vm656_vm6 = vcmp.eq.s32.totalorder %v1209_v59, %v1140_v43 }
  0x9f   : > { %vm543_vm4 = vcmp.eq.s32.totalorder %v1212_v60, %v1121_v37  ;;  %vm542_vm10 = vcmp.eq.s32.totalorder %v1212_v60, %v1137_v41  ;;  %vm2017_vm15 = vcmp.eq.s32.totalorder %v1188_v1, %v1140_v43  ;;  %v701_v33 = vadd.f32 %v1218_v62, %v621_v29 }
  0xa0   : > { %v734_v32 = vsel %vm2017_vm15, %v702_v22, %v622_v18  ;;  %v700_v39 = vadd.f32 %v1267_v10, %v620_v25  ;;  %v506_v34 = vsel %vm434_vm8, %v474_v24, %v394_v12  ;;  %v619_v1 = vsel %vm547_vm2, %v587_v31, %v507_v23 }
  0xa1   : > { %773 = vmatpush1.msra.mxu0 %v734_v32  ;;  %v586_v35 = vadd.f32 %v1257_v9, %v506_v34  ;;  %v473_v42 = vadd.f32 %v1200_v58, %v393_v48  ;;  %vm2018_vm15 = vcmp.eq.s32.totalorder %v1209_v59, %v1106_v30  ;;  %vm344_vm0 = vcmp.eq.s32.totalorder %v1090_v21, %v1106_v30 }
  0xa2   : > { %v392_v46 = vsel %vm2018_vm15, %v1253_v6, 0.0  ;;  %vm2019_vm14 = vcmp.eq.s32.totalorder %v1191_v54, %v1132_v40  ;;  %vm2020_vm2 = vcmp.eq.s32.totalorder %v1191_v54, %v1140_v43  ;;  %v699_v49 = vadd.f32 %v1218_v62, %v619_v1 }
  0xa3   : > { %v733_v44 = vsel %vm2019_vm14, %v701_v33, %v621_v29  ;;  %v732_v45 = vsel %vm2020_vm2, %v700_v39, %v620_v25  ;;  %v472_v50 = vadd.f32 %v1255_v7, %v392_v46  ;;  %vm655_vm15 = vcmp.eq.s32.totalorder %v1212_v60, %v1132_v40 }
  0xa4   : > { %vm654_vm8 = vcmp.eq.s32.totalorder %v1212_v60, %v1140_v43  ;;  %774 = vmatprep.subr.mxu0 %v733_v44  ;;  %v618_v63 = vsel %vm546_vm9, %v586_v35, %v506_v34  ;;  %v505_v54 = vsel %vm433_vm12, %v473_v42, %v393_v48  ;;  %v391_v36 = vsel %vm349_vm13, %v1198_v57, 0.0 }
  0xa5   : > { %v390_v2 = vsel %vm348_vm1, %v1253_v6, 0.0  ;;  %vm653_vm14 = vcmp.eq.s32.totalorder %v1224_v0, %v1132_v40  ;;  %vm540_vm9 = vcmp.eq.s32.totalorder %v1224_v0, %v1137_v41  ;;  %775 = vmatpush1.msra.mxu0 %v732_v45  ;;  %v731_v51 = vsel %vm659_vm5, %v699_v49, %v619_v1 }
  0xa6   : > { %v698_v47 = vadd.f32 %v1267_v10, %v618_v63  ;;  %v585_v3 = vadd.f32 %v1214_v61, %v505_v54  ;;  %v504_v8 = vsel %vm432_vm3, %v472_v50, %v392_v46  ;;  %vm539_vm13 = vcmp.eq.s32.totalorder %v1090_v21, %v1121_v37  ;;  %776 = vmatprep.subr.mxu0 %v731_v51 }
  0xa7   : > { %vm426_vm12 = vcmp.eq.s32.totalorder %v1090_v21, %v1124_v38  ;;  %v584_v4 = vadd.f32 %v1257_v9, %v504_v8  ;;  %v471_v5 = vadd.f32 %v1200_v58, %v391_v36  ;;  %v470_v11 = vadd.f32 %v1255_v7, %v390_v2 }
  0xa8   : > { %vm2021_vm1 = vcmp.eq.s32.totalorder %v1224_v0, %v1098_v26  ;;  %vm2022_vm5 = vcmp.eq.s32.totalorder %v1194_v55, %v1140_v43  ;;  %vm2023_vm3 = vcmp.eq.s32.totalorder %v1209_v59, %v1121_v37  ;;  %vm2024_vm2 = vcmp.eq.s32.totalorder %v1224_v0, %v1106_v30 }
  0xa9   : > { %v389_v12 = vsel %vm2021_vm1, %v1198_v57, 0.0  ;;  %v730_v52 = vsel %vm2022_vm5, %v698_v47, %v618_v63  ;;  %v617_v13 = vsel %vm2023_vm3, %v585_v3, %v505_v54  ;;  %v388_v16 = vsel %vm2024_vm2, %v1253_v6, 0.0 }
  0xaa   : > { %v469_v14 = vadd.f32 %v1200_v58, %v389_v12  ;;  %777 = vmatpush1.msra.mxu0 %v730_v52  ;;  %v697_v17 = vadd.f32 %v1218_v62, %v617_v13  ;;  %v616_v18 = vsel %vm544_vm11, %v584_v4, %v504_v8  ;;  %v503_v55 = vsel %vm431_vm7, %v471_v5, %v391_v36 }
  0xab   : > { %vm2025_vm1 = vcmp.eq.s32.totalorder %v1212_v60, %v1124_v38  ;;  %v696_v20 = vadd.f32 %v1267_v10, %v616_v18  ;;  %v583_v22 = vadd.f32 %v1214_v61, %v503_v55  ;;  %vm2026_vm5 = vcmp.eq.s32.totalorder %v1224_v0, %v1102_v28 }
  0xac   : > { %v502_v19 = vsel %vm2025_vm1, %v470_v11, %v390_v2  ;;  %v501_v24 = vsel %vm2026_vm5, %v469_v14, %v389_v12  ;;  %vm2027_vm11 = vcmp.eq.s32.totalorder %v1209_v59, %v1132_v40  ;;  %v468_v29 = vadd.f32 %v1255_v7, %v388_v16 }
  0xad   : > { %v582_v23 = vadd.f32 %v1257_v9, %v502_v19  ;;  %v729_v48 = vsel %vm2027_vm11, %v697_v17, %v617_v13  ;;  %v581_v27 = vadd.f32 %v1214_v61, %v501_v24  ;;  %vm2028_vm7 = vcmp.eq.s32.totalorder %v1090_v21, %v1098_v26 }
  0xae   : > { %v387_v25 = vsel %vm2028_vm7, %v1198_v57, 0.0  ;;  %778 = vmatprep.subr.mxu0 %v729_v48  ;;  %v728_v31 = vsel %vm656_vm6, %v696_v20, %v616_v18  ;;  %v615_v32 = vsel %vm543_vm4, %v583_v22, %v503_v55  ;;  %vm2029_vm3 = vcmp.eq.s32.totalorder %v1224_v0, %v1121_v37 }
  0xaf   : > { %v614_v33 = vsel %vm542_vm10, %v582_v23, %v502_v19  ;;  %v467_v39 = vadd.f32 %v1200_v58, %v387_v25  ;;  %779 = vmatpush1.msra.mxu0 %v728_v31  ;;  %v695_v34 = vadd.f32 %v1218_v62, %v615_v32  ;;  %v613_v57 = vsel %vm2029_vm3, %v581_v27, %v501_v24 }
  0xb0   : > { %v694_v26 = vadd.f32 %v1267_v10, %v614_v33  ;;  %vm2030_vm6 = vcmp.eq.s32.totalorder %v1224_v0, %v1124_v38  ;;  %v693_v1 = vadd.f32 %v1218_v62, %v613_v57  ;;  %vm2031_vm4 = vcmp.eq.s32.totalorder %v1090_v21, %v1102_v28  ;;  %v189_v38 = vld [vmem:[%s1973_s1] sm:$0x7] }
  0xb1   : > { %v500_v59 = vsel %vm2030_vm6, %v468_v29, %v388_v16  ;;  %v499_v58 = vsel %vm2031_vm4, %v467_v39, %v387_v25  ;;  %v386_v42 = vsel %vm344_vm0, %v1253_v6, 0.0  ;;  %v727_v46 = vsel %vm655_vm15, %v695_v34, %v615_v32 }
  0xb2   : > { %v580_v35 = vadd.f32 %v1257_v9, %v500_v59  ;;  %v726_v44 = vsel %vm654_vm8, %v694_v26, %v614_v33  ;;  %v579_v45 = vadd.f32 %v1214_v61, %v499_v58  ;;  %v466_v49 = vadd.f32 %v1255_v7, %v386_v42  ;;  %780 = vmatprep.subr.mxu0 %v727_v46 }
  0xb3   : > { %v725_v28 = vsel %vm653_vm14, %v693_v1, %v613_v57  ;;  %vm652_vm10 = vcmp.eq.s32.totalorder %v1224_v0, %v1140_v43  ;;  %vm651_vm0 = vcmp.eq.s32.totalorder %v1090_v21, %v1132_v40  ;;  %781 = vmatpush1.msra.mxu0 %v726_v44  ;;  %vm538_vm8 = vcmp.eq.s32.totalorder %v1090_v21, %v1137_v41 }
  0xb4   : > { %v612_v30 = vsel %vm540_vm9, %v580_v35, %v500_v59  ;;  %v611_v61 = vsel %vm539_vm13, %v579_v45, %v499_v58  ;;  %v498_v6 = vsel %vm426_vm12, %v466_v49, %v386_v42  ;;  %782 = vmatprep.subr.mxu0 %v725_v28  ;;  %vm650_vm15 = vcmp.eq.s32.totalorder %v1090_v21, %v1140_v43 }
  0xb5   : > { %v692_v60 = vadd.f32 %v1267_v10, %v612_v30  ;;  %v691_v0 = vadd.f32 %v1218_v62, %v611_v61  ;;  %v578_v7 = vadd.f32 %v1257_v9, %v498_v6  ;;  %v218_v62 = vsub.f32 1.0, %v1080_v56 }
  0xb6   : > { %v219_v9 = vsub.f32 1.0, %v1078_v53  ;;  %v1030_v12 = vmov 1966171168   ;;  %vm850_vm14 = vcmp.lt.s32.totalorder %v319_v15, 256 }
  0xb7   : > { %v724_v40 = vsel %vm652_vm10, %v692_v60, %v612_v30  ;;  %v723_v50 = vsel %vm651_vm0, %v691_v0, %v611_v61  ;;  %v610_v63 = vsel %vm538_vm8, %v578_v7, %v498_v6  ;;  %v222_v54 = vrot.slane %v218_v62, 1 }
  0xb8   : > { %783 = vmatpush1.msra.mxu0 %v724_v40  ;;  %v690_v37 = vadd.f32 %v1267_v10, %v610_v63  ;;  %v223_v36 = vrot.slane %v219_v9, 1  ;;  %v228_v43 = vrot.slane %v218_v62, 2  ;;  %v229_v47 = vrot.slane %v219_v9, 2 }
  0xb9   : > { %784 = vmatprep.subr.mxu0 %v723_v50  ;;  %v226_v2 = vmul.f32 %v222_v54, %v218_v62  ;;  %v234_v8 = vrot.slane %v218_v62, 3  ;;  %v235_v4 = vrot.slane %v219_v9, 3  ;;  %v834_v52 = vunpack.c.l.s4 %v1030_v12 }
  0xba   : > { %v722_v41 = vsel %vm650_vm15, %v690_v37, %v610_v63  ;;  %v227_v51 = vmul.f32 %v223_v36, %v219_v9 }
  0xbb   : > { %785 = vmatpush1.msra.mxu0 %v722_v41  ;;  %v232_v3 = vmul.f32 %v228_v43, %v226_v2  ;;  %v835_v56 = vunpack.c.0.s8 %v834_v52 }
  0xbc   : > { %819 = vmatmul.mubr.f32.vlgmr.msra.gmra.mxu0 %v189_v38  ;;  %v233_v10 = vmul.f32 %v229_v47, %v227_v51 }
  0xbd   : > { %v238_v5 = vmul.f32 %v234_v8, %v232_v3  ;;  %v838_v53 = vsub.s32 %v835_v56, %v1090_v21 }
  0xbe   : > { %v239_v11 = vmul.f32 %v235_v4, %v233_v10 }
  0xbf   : > { %v240_v13 = vsub.f32 1.0, %v238_v5 }
  0xc0   : > { %v241_v14 = vsub.f32 1.0, %v239_v11 }
  0xc2   : > { %v832_v16 = vcombine.high %v240_v13, %v241_v14 }
  0xc4   : > { %v839_v17 = vrot.slane %v832_v16, %v838_v53 }
  0xc6   : > { %v846_v18 = vrot.slane %v839_v17, %v838_v53 }
  0xc8   : > { %954 = vst.msk [vmem:[%s181_s22 + $0x3] ss:$4 sm:$0x3] %vm850_vm14, %v846_v18 }
 0x17c   : > { %v820_v55 = vpop.f32.mrf.mxu0 }
 0x17e   : > { %v822_v19 = vpop.f32.mrf.mxu0 }
 0x17f   : > { %v827_v20 = vcombine.low %v820_v55, %v822_v19 }
 0x181   : > { %829 = vst [vmem:[%s181_s22] sm:$0x77] %v827_v20 }
 0x182 PF: > { %s12_s11 = sadd.s32 1, %s1027_s11   ;;  %s2032_s9 = smov %s1023_s10 }
 0x183   : > { %p9_p5 = scmp.ge.s32.totalorder %s12_s11, 4   ;;  %s2033_s10 = smov %s2035_s12 }
 0x185   :  { %11 = sbr.rel (!%p9_p5) target bundleno = 2 (0x2), region = 59 }

</bundles_post_ra>
